<compile_context>
chip_gen: v5e
topology: v5e:2x2
jax: 0.10.0
libtpu: 0.0.40
codegen_flags: <defaults>
</compile_context>

<pallas_src>
import functools

import jax
import jax.numpy as jnp
from jax.experimental import pallas as pl
from jax.experimental.pallas import tpu as pltpu


def _round_up(x, m):
    return (x + m - 1) // m * m


def _cdiv(a, b):
    return (a + b - 1) // b


def _mlp_kernel(x_ref,
                w1_ref, b1_ref,
                w2_ref, b2_ref,
                w3_ref, b3_ref,
                w4_ref, b4_ref,
                w5_ref, b5_ref,
                out_ref):
    """Fused 5-layer MLP forward for one batch tile, entirely in VMEM.

    bf16 operands on the MXU with f32 accumulation; f32 biases added to the
    f32 accumulator, ReLU, then recast to bf16 for the next matmul.
    """
    # layer_1 + ReLU
    h = jnp.dot(x_ref[...], w1_ref[...], preferred_element_type=jnp.float32) + b1_ref[...]
    h = jnp.maximum(h, 0.0).astype(jnp.bfloat16)

    # layer_2 + ReLU  (z2 not returned: extract_features=False path)
    h = jnp.dot(h, w2_ref[...], preferred_element_type=jnp.float32) + b2_ref[...]
    h = jnp.maximum(h, 0.0).astype(jnp.bfloat16)

    # layer_3 + ReLU
    h = jnp.dot(h, w3_ref[...], preferred_element_type=jnp.float32) + b3_ref[...]
    h = jnp.maximum(h, 0.0).astype(jnp.bfloat16)

    # layer_4 + ReLU
    h = jnp.dot(h, w4_ref[...], preferred_element_type=jnp.float32) + b4_ref[...]
    h = jnp.maximum(h, 0.0).astype(jnp.bfloat16)

    # layer_5 (logits, no activation) — lane-dense padded output
    out = jnp.dot(h, w5_ref[...], preferred_element_type=jnp.float32) + b5_ref[...]
    out_ref[...] = out

    # TODO(synk): use_dropout=True branch (Dropout + BatchNorm1d) and the
    # extract_features=True output (cat([z2, z3])) are not implemented; the
    # reference forward with default flags never executes them.


@functools.partial(jax.jit, static_argnames=("batch_tile",))
def class_nnet_forward(x, params, *, batch_tile=None):
    """x: [B, num_features] f32. params: dict l1..l5 of (W [in,out], b [1,out]) f32.

    Returns f32 logits [B, num_classes].
    """
    B, F = x.shape
    (w1, b1), (w2, b2), (w3, b3), (w4, b4), (w5, b5) = (
        params["l1"], params["l2"], params["l3"], params["l4"], params["l5"]
    )
    num_classes = w5.shape[1]

    # ---- batch tiling: big tiles fill the MXU; pad ragged batches with zeros ----
    target = 256 if batch_tile is None else batch_tile
    bt = _round_up(min(target, _round_up(max(B, 1), 8)), 8)
    # keep >= 2 grid steps when the batch is large enough (v7x: 2 TensorCores)
    if _cdiv(B, bt) < 2 and B >= 128:
        bt = _round_up(_cdiv(B, 2), 8)
    b_pad = _round_up(B, bt)
    if b_pad != B:
        x = jnp.pad(x, ((0, b_pad - B), (0, 0)))

    # ---- lane-dense output: pad logits to a multiple of 128 lanes ----
    c_pad = _round_up(num_classes, 128)
    w5p = jnp.pad(w5, ((0, 0), (0, c_pad - num_classes)))
    b5p = jnp.pad(b5, ((0, 0), (0, c_pad - num_classes)))

    # bf16 inputs / weights (f32 accumulate in-kernel); biases stay f32.
    xb = x.astype(jnp.bfloat16)
    w1b, w2b, w3b, w4b, w5b = (w.astype(jnp.bfloat16) for w in (w1, w2, w3, w4, w5p))
    b1f, b2f, b3f, b4f, b5f = (b.astype(jnp.float32) for b in (b1, b2, b3, b4, b5p))

    grid = (b_pad // bt,)

    def const_spec(arr):
        # Whole array, same block every grid step -> single-buffer it.
        return pl.BlockSpec(arr.shape, lambda i: (0, 0),
                            pipeline_mode=pl.Buffered(1))

    in_specs = [
        pl.BlockSpec((bt, F), lambda i: (i, 0)),   # x tile (double-buffered)
        const_spec(w1b), const_spec(b1f),
        const_spec(w2b), const_spec(b2f),
        const_spec(w3b), const_spec(b3f),
        const_spec(w4b), const_spec(b4f),
        const_spec(w5b), const_spec(b5f),
    ]
    out_spec = pl.BlockSpec((bt, c_pad), lambda i: (i, 0))

    out = pl.pallas_call(
        _mlp_kernel,
        out_shape=jax.ShapeDtypeStruct((b_pad, c_pad), jnp.float32),
        grid_spec=pltpu.PrefetchScalarGridSpec(
            num_scalar_prefetch=0,
            grid=grid,
            in_specs=in_specs,
            out_specs=out_spec,
        ),
        compiler_params=pltpu.CompilerParams(
            dimension_semantics=("parallel",),
            vmem_limit_bytes=48 * 1024 * 1024,   # safe on v5e/v6e (128 MiB) and v7x (64 MiB)
        ),
    )(xb, w1b, b1f, w2b, b2f, w3b, b3f, w4b, b4f, w5b, b5f)

    return out[:B, :num_classes]


def init_params(key, num_features, num_classes):
    """Deterministic synthetic init matching nn.Linear shapes.
    PyTorch weight is [out, in]; we store it transposed as [in, out]."""
    dims = [num_features, 256, 256, 128, 64, num_classes]
    params = {}
    for idx in range(5):
        key, wk, bk = jax.random.split(key, 3)
        fan_in, fan_out = dims[idx], dims[idx + 1]
        bound = 1.0 / jnp.sqrt(fan_in)
        w = jax.random.uniform(wk, (fan_in, fan_out), jnp.float32, -bound, bound)
        b = jax.random.uniform(bk, (1, fan_out), jnp.float32, -bound, bound)
        params[f"l{idx + 1}"] = (w, b)
    return params


def reference_forward_bf16(x, params):
    """Matches the kernel's numerics: bf16 operands, f32 accumulate, f32 bias."""
    h = x.astype(jnp.bfloat16)
    for name in ["l1", "l2", "l3", "l4"]:
        w, b = params[name]
        h = jnp.dot(h, w.astype(jnp.bfloat16), preferred_element_type=jnp.float32) + b
        h = jnp.maximum(h, 0.0).astype(jnp.bfloat16)
    w, b = params["l5"]
    return jnp.dot(h, w.astype(jnp.bfloat16), preferred_element_type=jnp.float32) + b


def reference_forward_f32(x, params):
    h = x
    for name in ["l1", "l2", "l3", "l4"]:
        w, b = params[name]
        h = jnp.maximum(h @ w + b, 0.0)
    w, b = params["l5"]
    return h @ w + b


if __name__ == "__main__":
    key = jax.random.PRNGKey(0)
    # small shapes; batch=10 is deliberately not a multiple of 8 to exercise padding
    num_features, num_classes, batch = 32, 10, 10

    key, xk, pk = jax.random.split(key, 3)
    x = jax.random.normal(xk, (batch, num_features), jnp.float32)
    params = init_params(pk, num_features, num_classes)

    out = class_nnet_forward(x, params)
    out = jax.block_until_ready(out)
    assert out.shape == (batch, num_classes)

    ref_bf16 = reference_forward_bf16(x, params)
    ref_f32 = reference_forward_f32(x, params)
    assert jnp.allclose(out, ref_bf16, atol=1e-2, rtol=1e-2), "mismatch vs bf16-matched reference"
    assert jnp.allclose(out, ref_f32, atol=1e-1, rtol=1e-1), "mismatch vs f32 reference"

    print("KERNEL_OK")
</pallas_src>

<mosaic_0001>
module attributes {stable_mosaic.version = 11 : i64} {
  func.func @_mlp_kernel(%arg0: i32, %arg1: memref<16x32xbf16, #tpu.memory_space<vmem>>, %arg2: memref<32x256xbf16, #tpu.memory_space<vmem>>, %arg3: memref<1x256xf32, #tpu.memory_space<vmem>>, %arg4: memref<256x256xbf16, #tpu.memory_space<vmem>>, %arg5: memref<1x256xf32, #tpu.memory_space<vmem>>, %arg6: memref<256x128xbf16, #tpu.memory_space<vmem>>, %arg7: memref<1x128xf32, #tpu.memory_space<vmem>>, %arg8: memref<128x64xbf16, #tpu.memory_space<vmem>>, %arg9: memref<1x64xf32, #tpu.memory_space<vmem>>, %arg10: memref<64x128xbf16, #tpu.memory_space<vmem>>, %arg11: memref<1x128xf32, #tpu.memory_space<vmem>>, %arg12: memref<16x128xf32, #tpu.memory_space<vmem>>) attributes {dimension_semantics = [#tpu.dimension_semantics<parallel>], iteration_bounds = array<i64: 1>, scalar_prefetch = 0 : i64, scratch_operands = 0 : i64, tpu.core_type = #tpu.core_type<tc>, window_params = [{transform_indices = @transform_0, window_bounds = array<i64: 16, 32>}, {pipeline_mode = #tpu.pipeline_mode<synchronous>, transform_indices = @transform_1, window_bounds = array<i64: 32, 256>}, {pipeline_mode = #tpu.pipeline_mode<synchronous>, transform_indices = @transform_2, window_bounds = array<i64: 1, 256>}, {pipeline_mode = #tpu.pipeline_mode<synchronous>, transform_indices = @transform_3, window_bounds = array<i64: 256, 256>}, {pipeline_mode = #tpu.pipeline_mode<synchronous>, transform_indices = @transform_4, window_bounds = array<i64: 1, 256>}, {pipeline_mode = #tpu.pipeline_mode<synchronous>, transform_indices = @transform_5, window_bounds = array<i64: 256, 128>}, {pipeline_mode = #tpu.pipeline_mode<synchronous>, transform_indices = @transform_6, window_bounds = array<i64: 1, 128>}, {pipeline_mode = #tpu.pipeline_mode<synchronous>, transform_indices = @transform_7, window_bounds = array<i64: 128, 64>}, {pipeline_mode = #tpu.pipeline_mode<synchronous>, transform_indices = @transform_8, window_bounds = array<i64: 1, 64>}, {pipeline_mode = #tpu.pipeline_mode<synchronous>, transform_indices = @transform_9, window_bounds = array<i64: 64, 128>}, {pipeline_mode = #tpu.pipeline_mode<synchronous>, transform_indices = @transform_10, window_bounds = array<i64: 1, 128>}, {transform_indices = @transform_11, window_bounds = array<i64: 16, 128>}]} {
    %c0 = arith.constant 0 : index
    %c0_0 = arith.constant 0 : index
    %0 = vector.load %arg1[%c0, %c0_0] : memref<16x32xbf16, #tpu.memory_space<vmem>>, vector<16x32xbf16>
    %c0_1 = arith.constant 0 : index
    %c0_2 = arith.constant 0 : index
    %1 = vector.load %arg2[%c0_1, %c0_2] : memref<32x256xbf16, #tpu.memory_space<vmem>>, vector<32x256xbf16>
    %cst = arith.constant dense<0.000000e+00> : vector<16x256xf32>
    %2 = tpu.matmul %0, %1, %cst {dimension_numbers = #tpu.dot_dimension_numbers<[1], [0], [0], [1], [0, 0, 1, 1], [], []>} : vector<16x32xbf16>, vector<32x256xbf16>, vector<16x256xf32> -> vector<16x256xf32>
    %c0_3 = arith.constant 0 : index
    %c0_4 = arith.constant 0 : index
    %3 = vector.load %arg3[%c0_3, %c0_4] : memref<1x256xf32, #tpu.memory_space<vmem>>, vector<1x256xf32>
    %4 = vector.broadcast %3 : vector<1x256xf32> to vector<16x256xf32>
    %5 = arith.addf %2, %4 : vector<16x256xf32>
    %cst_5 = arith.constant 0.000000e+00 : f32
    %6 = vector.broadcast %cst_5 : f32 to vector<16x256xf32>
    %7 = arith.maximumf %5, %6 : vector<16x256xf32>
    %8 = arith.truncf %7 : vector<16x256xf32> to vector<16x256xbf16>
    %c0_6 = arith.constant 0 : index
    %c0_7 = arith.constant 0 : index
    %9 = vector.load %arg4[%c0_6, %c0_7] : memref<256x256xbf16, #tpu.memory_space<vmem>>, vector<256x256xbf16>
    %cst_8 = arith.constant dense<0.000000e+00> : vector<16x256xf32>
    %10 = tpu.matmul %8, %9, %cst_8 {dimension_numbers = #tpu.dot_dimension_numbers<[1], [0], [0], [1], [0, 0, 1, 1], [], []>} : vector<16x256xbf16>, vector<256x256xbf16>, vector<16x256xf32> -> vector<16x256xf32>
    %c0_9 = arith.constant 0 : index
    %c0_10 = arith.constant 0 : index
    %11 = vector.load %arg5[%c0_9, %c0_10] : memref<1x256xf32, #tpu.memory_space<vmem>>, vector<1x256xf32>
    %12 = vector.broadcast %11 : vector<1x256xf32> to vector<16x256xf32>
    %13 = arith.addf %10, %12 : vector<16x256xf32>
    %cst_11 = arith.constant 0.000000e+00 : f32
    %14 = vector.broadcast %cst_11 : f32 to vector<16x256xf32>
    %15 = arith.maximumf %13, %14 : vector<16x256xf32>
    %16 = arith.truncf %15 : vector<16x256xf32> to vector<16x256xbf16>
    %c0_12 = arith.constant 0 : index
    %c0_13 = arith.constant 0 : index
    %17 = vector.load %arg6[%c0_12, %c0_13] : memref<256x128xbf16, #tpu.memory_space<vmem>>, vector<256x128xbf16>
    %cst_14 = arith.constant dense<0.000000e+00> : vector<16x128xf32>
    %18 = tpu.matmul %16, %17, %cst_14 {dimension_numbers = #tpu.dot_dimension_numbers<[1], [0], [0], [1], [0, 0, 1, 1], [], []>} : vector<16x256xbf16>, vector<256x128xbf16>, vector<16x128xf32> -> vector<16x128xf32>
    %c0_15 = arith.constant 0 : index
    %c0_16 = arith.constant 0 : index
    %19 = vector.load %arg7[%c0_15, %c0_16] : memref<1x128xf32, #tpu.memory_space<vmem>>, vector<1x128xf32>
    %20 = vector.broadcast %19 : vector<1x128xf32> to vector<16x128xf32>
    %21 = arith.addf %18, %20 : vector<16x128xf32>
    %cst_17 = arith.constant 0.000000e+00 : f32
    %22 = vector.broadcast %cst_17 : f32 to vector<16x128xf32>
    %23 = arith.maximumf %21, %22 : vector<16x128xf32>
    %24 = arith.truncf %23 : vector<16x128xf32> to vector<16x128xbf16>
    %c0_18 = arith.constant 0 : index
    %c0_19 = arith.constant 0 : index
    %25 = vector.load %arg8[%c0_18, %c0_19] : memref<128x64xbf16, #tpu.memory_space<vmem>>, vector<128x64xbf16>
    %cst_20 = arith.constant dense<0.000000e+00> : vector<16x64xf32>
    %26 = tpu.matmul %24, %25, %cst_20 {dimension_numbers = #tpu.dot_dimension_numbers<[1], [0], [0], [1], [0, 0, 1, 1], [], []>} : vector<16x128xbf16>, vector<128x64xbf16>, vector<16x64xf32> -> vector<16x64xf32>
    %c0_21 = arith.constant 0 : index
    %c0_22 = arith.constant 0 : index
    %27 = vector.load %arg9[%c0_21, %c0_22] : memref<1x64xf32, #tpu.memory_space<vmem>>, vector<1x64xf32>
    %28 = vector.broadcast %27 : vector<1x64xf32> to vector<16x64xf32>
    %29 = arith.addf %26, %28 : vector<16x64xf32>
    %cst_23 = arith.constant 0.000000e+00 : f32
    %30 = vector.broadcast %cst_23 : f32 to vector<16x64xf32>
    %31 = arith.maximumf %29, %30 : vector<16x64xf32>
    %32 = arith.truncf %31 : vector<16x64xf32> to vector<16x64xbf16>
    %c0_24 = arith.constant 0 : index
    %c0_25 = arith.constant 0 : index
    %33 = vector.load %arg10[%c0_24, %c0_25] : memref<64x128xbf16, #tpu.memory_space<vmem>>, vector<64x128xbf16>
    %cst_26 = arith.constant dense<0.000000e+00> : vector<16x128xf32>
    %34 = tpu.matmul %32, %33, %cst_26 {dimension_numbers = #tpu.dot_dimension_numbers<[1], [0], [0], [1], [0, 0, 1, 1], [], []>} : vector<16x64xbf16>, vector<64x128xbf16>, vector<16x128xf32> -> vector<16x128xf32>
    %c0_27 = arith.constant 0 : index
    %c0_28 = arith.constant 0 : index
    %35 = vector.load %arg11[%c0_27, %c0_28] : memref<1x128xf32, #tpu.memory_space<vmem>>, vector<1x128xf32>
    %36 = vector.broadcast %35 : vector<1x128xf32> to vector<16x128xf32>
    %37 = arith.addf %34, %36 : vector<16x128xf32>
    %c0_29 = arith.constant 0 : index
    %c0_30 = arith.constant 0 : index
    %38 = vector.load %arg12[%c0_29, %c0_30] : memref<16x128xf32, #tpu.memory_space<vmem>>, vector<16x128xf32>
    tpu.vector_store %arg12[%c0_29, %c0_30], %37 {strides = array<i32>} : memref<16x128xf32, #tpu.memory_space<vmem>>, vector<16x128xf32>,
    return
  }
  func.func @transform_0(%arg0: i32) -> (i32, i32) {
    %c0_i32 = arith.constant 0 : i32
    %c0_i32_0 = arith.constant 0 : i32
    return %arg0, %c0_i32 : i32, i32
  }
  func.func @transform_1(%arg0: i32) -> (i32, i32) {
    %c0_i32 = arith.constant 0 : i32
    %c0_i32_0 = arith.constant 0 : i32
    %c0_i32_1 = arith.constant 0 : i32
    return %c0_i32, %c0_i32_0 : i32, i32
  }
  func.func @transform_2(%arg0: i32) -> (i32, i32) {
    %c0_i32 = arith.constant 0 : i32
    %c0_i32_0 = arith.constant 0 : i32
    %c0_i32_1 = arith.constant 0 : i32
    return %c0_i32, %c0_i32_0 : i32, i32
  }
  func.func @transform_3(%arg0: i32) -> (i32, i32) {
    %c0_i32 = arith.constant 0 : i32
    %c0_i32_0 = arith.constant 0 : i32
    %c0_i32_1 = arith.constant 0 : i32
    return %c0_i32, %c0_i32_0 : i32, i32
  }
  func.func @transform_4(%arg0: i32) -> (i32, i32) {
    %c0_i32 = arith.constant 0 : i32
    %c0_i32_0 = arith.constant 0 : i32
    %c0_i32_1 = arith.constant 0 : i32
    return %c0_i32, %c0_i32_0 : i32, i32
  }
  func.func @transform_5(%arg0: i32) -> (i32, i32) {
    %c0_i32 = arith.constant 0 : i32
    %c0_i32_0 = arith.constant 0 : i32
    %c0_i32_1 = arith.constant 0 : i32
    return %c0_i32, %c0_i32_0 : i32, i32
  }
  func.func @transform_6(%arg0: i32) -> (i32, i32) {
    %c0_i32 = arith.constant 0 : i32
    %c0_i32_0 = arith.constant 0 : i32
    %c0_i32_1 = arith.constant 0 : i32
    return %c0_i32, %c0_i32_0 : i32, i32
  }
  func.func @transform_7(%arg0: i32) -> (i32, i32) {
    %c0_i32 = arith.constant 0 : i32
    %c0_i32_0 = arith.constant 0 : i32
    %c0_i32_1 = arith.constant 0 : i32
    return %c0_i32, %c0_i32_0 : i32, i32
  }
  func.func @transform_8(%arg0: i32) -> (i32, i32) {
    %c0_i32 = arith.constant 0 : i32
    %c0_i32_0 = arith.constant 0 : i32
    %c0_i32_1 = arith.constant 0 : i32
    return %c0_i32, %c0_i32_0 : i32, i32
  }
  func.func @transform_9(%arg0: i32) -> (i32, i32) {
    %c0_i32 = arith.constant 0 : i32
    %c0_i32_0 = arith.constant 0 : i32
    %c0_i32_1 = arith.constant 0 : i32
    return %c0_i32, %c0_i32_0 : i32, i32
  }
  func.func @transform_10(%arg0: i32) -> (i32, i32) {
    %c0_i32 = arith.constant 0 : i32
    %c0_i32_0 = arith.constant 0 : i32
    %c0_i32_1 = arith.constant 0 : i32
    return %c0_i32, %c0_i32_0 : i32, i32
  }
  func.func @transform_11(%arg0: i32) -> (i32, i32) {
    %c0_i32 = arith.constant 0 : i32
    %c0_i32_0 = arith.constant 0 : i32
    return %arg0, %c0_i32 : i32, i32
  }
}

</mosaic_0001>

<bundles_post_ra>
// kernel: class_nnet_forward.1
= control target key start
LH: loop header
LB: loop body
LE: loop exit
PB: predicated region body
PF: predicated region fallthrough
CT: control target
= control target key end

     0   :  { %vm77_vm0 = vcmask 261120   ;;  %s1443_s0 = inlined_call_operand.vmem [shape: bf16[16,32], index: 0, kind: input, shape index: {}]   ;;  %s1444_s1 = inlined_call_operand.vmem [shape: bf16[32,256], index: 1, kind: input, shape index: {}]   ;;  %s1445_s2 = inlined_call_operand.vmem [shape: f32[1,256], index: 2, kind: input, shape index: {}]   ;;  %s1446_s3 = inlined_call_operand.vmem [shape: bf16[256,256], index: 3, kind: input, shape index: {}]   ;;  %s1447_s4 = inlined_call_operand.vmem [shape: f32[1,256], index: 4, kind: input, shape index: {}]   ;;  %s1448_s5 = inlined_call_operand.vmem [shape: bf16[256,128], index: 5, kind: input, shape index: {}]   ;;  %s1449_s6 = inlined_call_operand.vmem [shape: f32[1,128], index: 6, kind: input, shape index: {}]   ;;  %s1450_s7 = inlined_call_operand.vmem [shape: bf16[128,64], index: 7, kind: input, shape index: {}]   ;;  %s1451_s8 = inlined_call_operand.vmem [shape: f32[1,64], index: 8, kind: input, shape index: {}]   ;;  %s1452_s9 = inlined_call_operand.vmem [shape: bf16[64,128], index: 9, kind: input, shape index: {}]   ;;  %s1453_s10 = inlined_call_operand.vmem [shape: f32[1,128], index: 10, kind: input, shape index: {}]   ;;  %s1454_s11 = inlined_call_operand.hbm [shape: f32[16,128], index: 11, kind: output, shape index: {}]  }
   0x1   :  { %v711_v0 = vld [vmem:[%s1444_s1 + $0x10] sm:$0xf]  ;;  %v964_v1 = vld [vmem:[%s1444_s1 + $0x14] sm:$0xf0]  ;;  %v963_v2 = vld [vmem:[%s1444_s1 + $0x14] sm:$0xf] }
   0x2   :  { %v712_v3 = vor.u32 %v964_v1, %v711_v0  ;;  %v713_v4 = vld [vmem:[%s1444_s1 + $0x18] sm:$0xf0]  ;;  %v703_v5 = vld [vmem:[%s1444_s1] sm:$0xf]  ;;  %v962_v6 = vld [vmem:[%s1444_s1 + $0x4] sm:$0xf0] }
   0x3   :  { %v716_v7 = vor.u32 %v963_v2, %v713_v4  ;;  %v961_v8 = vld [vmem:[%s1444_s1 + $0x4] sm:$0xf]  ;;  %v705_v9 = vld [vmem:[%s1444_s1 + $0x8] sm:$0xf0]  ;;  %v704_v10 = vor.u32 %v962_v6, %v703_v5  ;;  %v777_v11 = vld [vmem:[%s1446_s3 + $0x70] sm:$0xf] }
   0x4   :  { %87 = vmatpush.bf16.msra.mxu0 %v712_v3  ;;  %v980_v12 = vld [vmem:[%s1446_s3 + $0x74] sm:$0xf0]  ;;  %v841_v13 = vld [vmem:[%s1446_s3 + $0xf0] sm:$0xf]  ;;  %v708_v14 = vor.u32 %v961_v8, %v705_v9  ;;  %v960_v15 = vld [vmem:[%s1443_s0] sm:$0xff] }
   0x5   :  { %101 = vmatpush.bf16.msra.mxu1 %v716_v7  ;;  %v778_v16 = vor.u32 %v980_v12, %v777_v11  ;;  %v996_v17 = vld [vmem:[%s1446_s3 + $0xf4] sm:$0xf0]  ;;  %v979_v18 = vld [vmem:[%s1446_s3 + $0x74] sm:$0xf]  ;;  %v779_v19 = vld [vmem:[%s1446_s3 + $0x78] sm:$0xf0] }
   0x6   :  { %v842_v20 = vor.u32 %v996_v17, %v841_v13  ;;  %v782_v21 = vor.u32 %v979_v18, %v779_v19  ;;  %v995_v22 = vld [vmem:[%s1446_s3 + $0xf4] sm:$0xf]  ;;  %v843_v23 = vld [vmem:[%s1446_s3 + $0xf8] sm:$0xf0]  ;;  %v769_v24 = vld [vmem:[%s1446_s3 + $0x60] sm:$0xf] }
   0x7   :  { %313 = vmatpush.bf16.msra.mxu2 %v778_v16  ;;  %v846_v25 = vor.u32 %v995_v22, %v843_v23  ;;  %v978_v26 = vld [vmem:[%s1446_s3 + $0x64] sm:$0xf0]  ;;  %v833_v27 = vld [vmem:[%s1446_s3 + $0xe0] sm:$0xf]  ;;  %v977_v31 = vld [vmem:[%s1446_s3 + $0x64] sm:$0xf] }
   0x8   :  { %v994_v28 = vld [vmem:[%s1446_s3 + $0xe4] sm:$0xf0]  ;;  %88 = vmatpush.bf16.msra.mxu0 %v704_v10  ;;  %327 = vmatpush.bf16.msra.mxu3 %v842_v20  ;;  %v770_v29 = vor.u32 %v978_v26, %v769_v24  ;;  %v771_v32 = vld [vmem:[%s1446_s3 + $0x68] sm:$0xf0]  ;;  %v993_v33 = vld [vmem:[%s1446_s3 + $0xe4] sm:$0xf] }
   0x9   :  { %v834_v30 = vor.u32 %v994_v28, %v833_v27  ;;  %102 = vmatpush.bf16.msra.mxu1 %v708_v14  ;;  %v774_v34 = vor.u32 %v977_v31, %v771_v32  ;;  %v835_v35 = vld [vmem:[%s1446_s3 + $0xe8] sm:$0xf0]  ;;  %v761_v36 = vld [vmem:[%s1446_s3 + $0x50] sm:$0xf]  ;;  %v976_v37 = vld [vmem:[%s1446_s3 + $0x54] sm:$0xf0] }
   0xa   :  { %v838_v38 = vor.u32 %v993_v33, %v835_v35  ;;  %v825_v39 = vld [vmem:[%s1446_s3 + $0xd0] sm:$0xf]  ;;  %v992_v40 = vld [vmem:[%s1446_s3 + $0xd4] sm:$0xf0]  ;;  %v975_v41 = vld [vmem:[%s1446_s3 + $0x54] sm:$0xf]  ;;  %v762_v42 = vor.u32 %v976_v37, %v761_v36 }
   0xb   :  { %717 = vmatmul.msk.bf16.vlgmr.msra.gmra.mxu0 %vm77_vm0, %v960_v15  ;;  %314 = vmatpush.bf16.msra.mxu2 %v770_v29  ;;  %v763_v43 = vld [vmem:[%s1446_s3 + $0x58] sm:$0xf0]  ;;  %v991_v44 = vld [vmem:[%s1446_s3 + $0xd4] sm:$0xf]  ;;  %v826_v46 = vor.u32 %v992_v40, %v825_v39  ;;  %v753_v47 = vld [vmem:[%s1446_s3 + $0x40] sm:$0xf] }
   0xc   :  { %341 = vmatpush.bf16.msrb.mxu0 %v782_v21  ;;  %v827_v45 = vld [vmem:[%s1446_s3 + $0xd8] sm:$0xf0]  ;;  %718 = vmatmul.msk.bf16.vlgmr.msra.gmra.mxu1 %vm77_vm0, %v960_v15  ;;  %v974_v48 = vld [vmem:[%s1446_s3 + $0x44] sm:$0xf0]  ;;  %v766_v49 = vor.u32 %v975_v41, %v763_v43  ;;  %v817_v50 = vld [vmem:[%s1446_s3 + $0xc0] sm:$0xf] }
   0xd   :  { %355 = vmatpush.bf16.msrb.mxu1 %v846_v25  ;;  %328 = vmatpush.bf16.msra.mxu3 %v834_v30  ;;  %v990_v51 = vld [vmem:[%s1446_s3 + $0xc4] sm:$0xf0]  ;;  %v830_v52 = vor.u32 %v991_v44, %v827_v45  ;;  %v973_v53 = vld [vmem:[%s1446_s3 + $0x44] sm:$0xf]  ;;  %v755_v54 = vld [vmem:[%s1446_s3 + $0x48] sm:$0xf0]  ;;  %v754_v56 = vor.u32 %v974_v48, %v753_v47 }
   0xe   :  { %v989_v55 = vld [vmem:[%s1446_s3 + $0xc4] sm:$0xf]  ;;  %v819_v57 = vld [vmem:[%s1446_s3 + $0xc8] sm:$0xf0]  ;;  %v818_v58 = vor.u32 %v990_v51, %v817_v50 }
   0xf   :  { %315 = vmatpush.bf16.msra.mxu2 %v762_v42 }
  0x10   :  { %342 = vmatpush.bf16.msrb.mxu0 %v774_v34 }
  0x11   :  { %356 = vmatpush.bf16.msrb.mxu1 %v838_v38  ;;  %329 = vmatpush.bf16.msra.mxu3 %v826_v46 }
  0x12   :  { %16 = vsyncpa [#allocation3], 0  ;;  %v758_v59 = vor.u32 %v973_v53, %v755_v54  ;;  %v822_v60 = vor.u32 %v989_v55, %v819_v57  ;;  %v745_v61 = vld [vmem:[%s1446_s3 + $0x30] sm:$0xf]  ;;  %v972_v62 = vld [vmem:[%s1446_s3 + $0x34] sm:$0xf0] }
  0x13   :  { %316 = vmatpush.bf16.msra.mxu2 %v754_v56  ;;  %v809_v63 = vld [vmem:[%s1446_s3 + $0xb0] sm:$0xf]  ;;  %v746_v0 = vor.u32 %v972_v62, %v745_v61  ;;  %v988_v1 = vld [vmem:[%s1446_s3 + $0xb4] sm:$0xf0]  ;;  %v971_v2 = vld [vmem:[%s1446_s3 + $0x34] sm:$0xf] }
  0x14   :  { %343 = vmatpush.bf16.msrb.mxu0 %v766_v49  ;;  %v747_v3 = vld [vmem:[%s1446_s3 + $0x38] sm:$0xf0]  ;;  %v810_v4 = vor.u32 %v988_v1, %v809_v63  ;;  %v987_v6 = vld [vmem:[%s1446_s3 + $0xb4] sm:$0xf]  ;;  %v737_v9 = vld [vmem:[%s1446_s3 + $0x20] sm:$0xf] }
  0x15   :  { %357 = vmatpush.bf16.msrb.mxu1 %v830_v52  ;;  %330 = vmatpush.bf16.msra.mxu3 %v818_v58  ;;  %v750_v5 = vor.u32 %v971_v2, %v747_v3  ;;  %v811_v7 = vld [vmem:[%s1446_s3 + $0xb8] sm:$0xf0]  ;;  %v970_v10 = vld [vmem:[%s1446_s3 + $0x24] sm:$0xf0]  ;;  %v801_v12 = vld [vmem:[%s1446_s3 + $0xa0] sm:$0xf] }
  0x16   :  { %v814_v8 = vor.u32 %v987_v6, %v811_v7  ;;  %v738_v11 = vor.u32 %v970_v10, %v737_v9  ;;  %v986_v13 = vld [vmem:[%s1446_s3 + $0xa4] sm:$0xf0]  ;;  %v969_v14 = vld [vmem:[%s1446_s3 + $0x24] sm:$0xf]  ;;  %v739_v16 = vld [vmem:[%s1446_s3 + $0x28] sm:$0xf0] }
  0x17   :  { %317 = vmatpush.bf16.msra.mxu2 %v746_v0  ;;  %v802_v15 = vor.u32 %v986_v13, %v801_v12  ;;  %v985_v17 = vld [vmem:[%s1446_s3 + $0xa4] sm:$0xf]  ;;  %v803_v18 = vld [vmem:[%s1446_s3 + $0xa8] sm:$0xf0]  ;;  %v742_v19 = vor.u32 %v969_v14, %v739_v16  ;;  %v729_v21 = vld [vmem:[%s1446_s3 + $0x10] sm:$0xf] }
  0x18   :  { %344 = vmatpush.bf16.msrb.mxu0 %v758_v59  ;;  %v806_v20 = vor.u32 %v985_v17, %v803_v18  ;;  %v968_v22 = vld [vmem:[%s1446_s3 + $0x14] sm:$0xf0]  ;;  %v793_v23 = vld [vmem:[%s1446_s3 + $0x90] sm:$0xf]  ;;  %v967_v26 = vld [vmem:[%s1446_s3 + $0x14] sm:$0xf] }
  0x19   :  { %358 = vmatpush.bf16.msrb.mxu1 %v822_v60  ;;  %331 = vmatpush.bf16.msra.mxu3 %v810_v4  ;;  %v730_v24 = vor.u32 %v968_v22, %v729_v21  ;;  %v984_v25 = vld [vmem:[%s1446_s3 + $0x94] sm:$0xf0]  ;;  %v731_v27 = vld [vmem:[%s1446_s3 + $0x18] sm:$0xf0]  ;;  %v983_v30 = vld [vmem:[%s1446_s3 + $0x94] sm:$0xf] }
  0x1a   :  { %v794_v28 = vor.u32 %v984_v25, %v793_v23  ;;  %v734_v29 = vor.u32 %v967_v26, %v731_v27  ;;  %v795_v31 = vld [vmem:[%s1446_s3 + $0x98] sm:$0xf0]  ;;  %v721_v33 = vld [vmem:[%s1446_s3] sm:$0xf]  ;;  %v966_v34 = vld [vmem:[%s1446_s3 + $0x4] sm:$0xf0] }
  0x1b   :  { %318 = vmatpush.bf16.msra.mxu2 %v738_v11  ;;  %v798_v32 = vor.u32 %v983_v30, %v795_v31  ;;  %v785_v35 = vld [vmem:[%s1446_s3 + $0x80] sm:$0xf]  ;;  %v722_v36 = vor.u32 %v966_v34, %v721_v33  ;;  %v982_v37 = vld [vmem:[%s1446_s3 + $0x84] sm:$0xf0]  ;;  %v965_v38 = vld [vmem:[%s1446_s3 + $0x4] sm:$0xf] }
  0x1c   :  { %345 = vmatpush.bf16.msrb.mxu0 %v750_v5  ;;  %v723_v39 = vld [vmem:[%s1446_s3 + $0x8] sm:$0xf0]  ;;  %v786_v40 = vor.u32 %v982_v37, %v785_v35  ;;  %v981_v42 = vld [vmem:[%s1446_s3 + $0x84] sm:$0xf]  ;;  %v1012_v45 = vld [vmem:[%s1448_s5 + $0x78] sm:$0xff]  ;;  %vm659_vm1 = vcmask 523264  }
  0x1d   :  { %359 = vmatpush.bf16.msrb.mxu1 %v814_v8  ;;  %332 = vmatpush.bf16.msra.mxu3 %v802_v15  ;;  %v726_v41 = vor.u32 %v965_v38, %v723_v39  ;;  %v787_v43 = vld [vmem:[%s1446_s3 + $0x88] sm:$0xf0]  ;;  %v1004_v46 = vld [vmem:[%s1448_s5 + $0x38] sm:$0xff]  ;;  %v1011_v47 = vld [vmem:[%s1448_s5 + $0x70] sm:$0xff]  ;;  %s1058_s12 = smov 128   ;;  %s1059_s13 = smov 8  }
  0x1e   :  { %v790_v44 = vor.u32 %v981_v42, %v787_v43  ;;  %v1003_v48 = vld [vmem:[%s1448_s5 + $0x30] sm:$0xff]  ;;  %v1010_v49 = vld [vmem:[%s1448_s5 + $0x68] sm:$0xff]  ;;  %v1009_v50 = vld [vmem:[%s1448_s5 + $0x60] sm:$0xff] }
  0x1f   :  { %319 = vmatpush.bf16.msra.mxu2 %v730_v24  ;;  %v46_v51 = vld [vmem:[%s1445_s2] sm:$0x3]  ;;  %v1002_v4 = vld [vmem:[%s1448_s5 + $0x28] sm:$0xff]  ;;  %v1008_v5 = vld [vmem:[%s1448_s5 + $0x58] sm:$0xff] }
  0x20   :  { %346 = vmatpush.bf16.msrb.mxu0 %v742_v19  ;;  %v48_v54 = vperm.slane %v46_v51, 0  ;;  %v49_v55 = vperm.slane %v46_v51, 1  ;;  %v1001_v6 = vld [vmem:[%s1448_s5 + $0x20] sm:$0xff]  ;;  %v1007_v7 = vld [vmem:[%s1448_s5 + $0x50] sm:$0xff]  ;;  %v1000_v8 = vld [vmem:[%s1448_s5 + $0x18] sm:$0xff] }
  0x21   :  { %360 = vmatpush.bf16.msrb.mxu1 %v806_v20  ;;  %333 = vmatpush.bf16.msra.mxu3 %v794_v28  ;;  %v1006_v9 = vld [vmem:[%s1448_s5 + $0x48] sm:$0xff]  ;;  %v999_v10 = vld [vmem:[%s1448_s5 + $0x10] sm:$0xff]  ;;  %v1005_v11 = vld [vmem:[%s1448_s5 + $0x40] sm:$0xff] }
  0x22   :  { %v998_v12 = vld [vmem:[%s1448_s5 + $0x8] sm:$0xff]  ;;  %v997_v13 = vld [vmem:[%s1448_s5] sm:$0xff]  ;;  %v1020_v14 = vld [vmem:[%s1450_s7 + $0x38] sm:$0xff] }
  0x23   :  { %320 = vmatpush.bf16.msra.mxu2 %v722_v36  ;;  %v1019_v15 = vld [vmem:[%s1450_s7 + $0x30] sm:$0xff]  ;;  %v147_v16 = vld [vmem:[%s1447_s4] sm:$0x3]  ;;  %v1016_v43 = vld [vmem:[%s1450_s7 + $0x18] sm:$0xff] }
  0x24   :  { %347 = vmatpush.bf16.msrb.mxu0 %v734_v29  ;;  %v150_v18 = vperm.slane %v147_v16, 1  ;;  %v149_v22 = vperm.slane %v147_v16, 0  ;;  %v1017_v42 = vld [vmem:[%s1450_s7 + $0x20] sm:$0xff] }
  0x25   :  { %361 = vmatpush.bf16.msrb.mxu1 %v798_v32  ;;  %334 = vmatpush.bf16.msra.mxu3 %v786_v40 }
  0x27   :  { %507 = vmatpush.bf16.msrb.mxu2 %v1004_v46  ;;  %v1013_v46 = vld [vmem:[%s1450_s7] sm:$0xff] }
  0x28   :  { %348 = vmatpush.bf16.msrb.mxu0 %v726_v41  ;;  %v1018_v41 = vld [vmem:[%s1450_s7 + $0x28] sm:$0xff] }
  0x29   :  { %362 = vmatpush.bf16.msrb.mxu1 %v790_v44  ;;  %521 = vmatpush.bf16.msrb.mxu3 %v1012_v45  ;;  %v1015_v44 = vld [vmem:[%s1450_s7 + $0x10] sm:$0xff]  ;;  %v1014_v45 = vld [vmem:[%s1450_s7 + $0x8] sm:$0xff] }
  0x2b   :  { %508 = vmatpush.bf16.msrb.mxu2 %v1003_v48 }
  0x2c   :  { %606 = vmatpush.bf16.msra.mxu0 %v1020_v14 }
  0x2d   :  { %522 = vmatpush.bf16.msrb.mxu3 %v1011_v47  ;;  %v1024_v47 = vld [vmem:[%s1452_s9 + $0x18] sm:$0xff] }
  0x2e   :  { %667 = vmatpush.bf16.msra.mxu1 %v1024_v47 }
  0x2f   :  { %509 = vmatpush.bf16.msrb.mxu2 %v1002_v4 }
  0x30   :  { %607 = vmatpush.bf16.msra.mxu0 %v1019_v15 }
  0x31   :  { %523 = vmatpush.bf16.msrb.mxu3 %v1010_v49 }
  0x33   :  { %510 = vmatpush.bf16.msrb.mxu2 %v1001_v6 }
  0x34   :  { %608 = vmatpush.bf16.msra.mxu0 %v1018_v41 }
  0x35   :  { %524 = vmatpush.bf16.msrb.mxu3 %v1009_v50  ;;  %v1028_v50 = vld [vmem:[%s1449_s6] ss:$0 sm:$0xff] }
  0x37   :  { %511 = vmatpush.bf16.msrb.mxu2 %v1000_v8 }
  0x38   :  { %609 = vmatpush.bf16.msra.mxu0 %v1017_v42 }
  0x39   :  { %525 = vmatpush.bf16.msrb.mxu3 %v1008_v5 }
  0x3b   :  { %512 = vmatpush.bf16.msrb.mxu2 %v999_v10 }
  0x3c   :  { %610 = vmatpush.bf16.msra.mxu0 %v1016_v43 }
  0x3d   :  { %526 = vmatpush.bf16.msrb.mxu3 %v1007_v7  ;;  %v1030_v7 = vld [vmem:[%s1453_s10] ss:$0 sm:$0xff] }
  0x3f   :  { %513 = vmatpush.bf16.msrb.mxu2 %v998_v12 }
  0x40   :  { %611 = vmatpush.bf16.msra.mxu0 %v1015_v44 }
  0x41   :  { %527 = vmatpush.bf16.msrb.mxu3 %v1006_v9 }
  0x43   :  { %514 = vmatpush.bf16.msrb.mxu2 %v997_v13 }
  0x44   :  { %612 = vmatpush.bf16.msra.mxu0 %v1014_v45 }
  0x45   :  { %528 = vmatpush.bf16.msrb.mxu3 %v1005_v11 }
  0x48   :  { %613 = vmatpush.bf16.msra.mxu0 %v1013_v46 }
  0x88   :  { %v90_v52 = vpop.f32.mrf.mxu0 }
  0x89   :  { %v104_v53 = vpop.f32.mrf.mxu1  ;;  %v91_v56 = vadd.f32 %v90_v52, %v48_v54 }
  0x8a   :  { %v105_v57 = vadd.f32 %v104_v53, %v49_v55 }
  0x8b   :  { %v109_v62 = vmax.f32 %v91_v56, 0.0 }
  0x8c   :  { %v110_v0 = vmax.f32 %v105_v57, 0.0 }
  0x90   :  { %v92_v58 = vpop.f32.mrf.mxu0 }
  0x91   :  { %v93_v59 = vadd.f32 %v92_v58, %v48_v54  ;;  %v106_v60 = vpop.f32.mrf.mxu1 }
  0x92   :  { %v107_v61 = vadd.f32 %v106_v60, %v49_v55  ;;  %v1023_v60 = vld [vmem:[%s1452_s9 + $0x10] sm:$0xff] }
  0x93   :  { %v111_v63 = vmax.f32 %v93_v59, 0.0  ;;  %668 = vmatpush.bf16.msra.mxu1 %v1023_v60 }
  0x94   :  { %v112_v1 = vmax.f32 %v107_v61, 0.0  ;;  %v1022_v61 = vld [vmem:[%s1452_s9 + $0x8] sm:$0xff] }
  0x95   :  { %v113_v2 = vpack.c.bf16 %v111_v63, %v109_v62  ;;  %v1021_v62 = vld [vmem:[%s1452_s9] sm:$0xff]  ;;  %s1057_s9 = smov [#allocation2]  }
  0x96   :  { %v114_v3 = vpack.c.bf16 %v112_v1, %v110_v0  ;;  %v1029_v0 = vld [vmem:[%s1451_s8] ss:$0 sm:$0xff]  ;;  %s683_s30 = sshll.u32 %s1057_s9, 4  ;;  %s685_s8 = sshll.u32 %s1454_s11, 4  ;;  %s684_s30 = int_to_ptr.vmem [resolvable:$true] %s683_s30  ;;  %s686_s8 = int_to_ptr.hbm [resolvable:$true] %s685_s8 }
  0x97   :  { %321 = vmatmul.bf16.vlgmr.msra.gmra.mxu2 %v113_v2  ;;  %349 = vmatmul.bf16.vlgmr.msrb.gmra.mxu0 %v113_v2 }
  0x98   :  { %335 = vmatmul.bf16.vlgmr.msra.gmra.mxu3 %v114_v3  ;;  %363 = vmatmul.bf16.vlgmr.msrb.gmra.mxu1 %v114_v3 }
  0x99   :  { %669 = vmatpush.bf16.msra.mxu1 %v1022_v61 }
  0x9d   :  { %670 = vmatpush.bf16.msra.mxu1 %v1021_v62 }
 0x114   :  { %v350_v17 = vpop.f32.mrf.mxu0 }
 0x115   :  { %v364_v19 = vpop.f32.mrf.mxu1  ;;  %v351_v20 = vadd.f32 %v350_v17, %v150_v18 }
 0x117   :  { %v365_v25 = vadd.f32 %v364_v19, %v351_v20 }
 0x119   :  { %v370_v30 = vmax.f32 %v365_v25, 0.0 }
 0x11a   :  { %v322_v21 = vpop.f32.mrf.mxu2 }
 0x11b   :  { %v336_v23 = vpop.f32.mrf.mxu3  ;;  %v323_v28 = vadd.f32 %v322_v21, %v149_v22 }
 0x11c   :  { %v352_v24 = vpop.f32.mrf.mxu0 }
 0x11d   :  { %v353_v26 = vadd.f32 %v352_v24, %v150_v18  ;;  %v366_v27 = vpop.f32.mrf.mxu1  ;;  %v337_v33 = vadd.f32 %v336_v23, %v323_v28 }
 0x11f   :  { %v367_v29 = vadd.f32 %v366_v27, %v353_v26  ;;  %v369_v38 = vmax.f32 %v337_v33, 0.0 }
 0x121   :  { %v372_v31 = vmax.f32 %v367_v29, 0.0 }
 0x122   :  { %v324_v32 = vpop.f32.mrf.mxu2 }
 0x123   :  { %v374_v34 = vpack.c.bf16 %v372_v31, %v370_v30  ;;  %v325_v35 = vadd.f32 %v324_v32, %v149_v22  ;;  %v338_v36 = vpop.f32.mrf.mxu3 }
 0x125   :  { %v339_v37 = vadd.f32 %v338_v36, %v325_v35  ;;  %529 = vmatmul.bf16.vlgmr.msrb.gmra.mxu3 %v374_v34 }
 0x127   :  { %v371_v39 = vmax.f32 %v339_v37, 0.0 }
 0x129   :  { %v373_v40 = vpack.c.bf16 %v371_v39, %v369_v38 }
 0x12b   :  { %515 = vmatmul.bf16.vlgmr.msrb.gmra.mxu2 %v373_v40 }
 0x1a8   :  { %v530_v48 = vpop.f32.mrf.mxu3 }
 0x1ae   :  { %v516_v49 = vpop.f32.mrf.mxu2 }
 0x1af   :  { %v517_v51 = vadd.f32 %v1028_v50, %v516_v49 }
 0x1b0   :  { %v532_v55 = vpop.f32.mrf.mxu3 }
 0x1b1   :  { %v531_v53 = vadd.f32 %v530_v48, %v517_v51 }
 0x1b3   :  { %v535_v57 = vmax.f32 %v531_v53, 0.0 }
 0x1b6   :  { %v518_v52 = vpop.f32.mrf.mxu2 }
 0x1b7   :  { %v519_v54 = vadd.f32 %v1028_v50, %v518_v52 }
 0x1b9   :  { %v533_v56 = vadd.f32 %v532_v55, %v519_v54 }
 0x1bb   :  { %v536_v58 = vmax.f32 %v533_v56, 0.0 }
 0x1bd   :  { %v537_v59 = vpack.c.bf16 %v536_v58, %v535_v57 }
 0x1bf   :  { %614 = vmatmul.bf16.vlgmr.msra.gmra.mxu0 %v537_v59 }
 0x23c   :  { %v615_v63 = vpop.f32.mrf.mxu0 }
 0x23d   :  { %v616_v1 = vadd.f32 %v1029_v0, %v615_v63 }
 0x23f   :  { %v620_v4 = vmax.f32 %v616_v1, 0.0 }
 0x244   :  { %v617_v2 = vpop.f32.mrf.mxu0 }
 0x245   :  { %v618_v3 = vadd.f32 %v1029_v0, %v617_v2 }
 0x247   :  { %v621_v5 = vmax.f32 %v618_v3, 0.0 }
 0x249   :  { %v622_v6 = vpack.c.bf16 %v621_v5, %v620_v4 }
 0x24b   :  { %959 = vmatmul.msk.bf16.vlgmr.msra.gmra.mxu1 %vm659_vm1, %v622_v6 }
 0x2c8   :  { %v672_v8 = vpop.f32.mrf.mxu1 }
 0x2c9   :  { %v673_v9 = vadd.f32 %v1030_v7, %v672_v8 }
 0x2cb   :  { %677 = vst [vmem:[#allocation2] sm:$0xff] %v673_v9 }
 0x2d0   :  { %v674_v10 = vpop.f32.mrf.mxu1 }
 0x2d1   :  { %v675_v11 = vadd.f32 %v1030_v7, %v674_v10 }
 0x2d3   :  { %678 = vst [vmem:[#allocation2 + $0x8] sm:$0xff] %v675_v11 }
 0x2d4   :  { %691 = dma.vmem_to_hbm [thread:$0]  %s684_s30, 256, %s686_s8, [#allocation3], %s1058_s12, %s1058_s12, %s1059_s13  }
 0x2d5   :  { %1055 = dma.done.wait [#allocation3], 256  }
 0x2d6   :  { %1056 = vsyncadd [#allocation3], 4294967040 }
 0x2d7   :  { %696 = vsyncpa [#allocation3], 1 }

</bundles_post_ra>
